<compile_context>
chip_gen: v5e
topology: v5e:2x2
jax: 0.10.0
libtpu: 0.0.40
codegen_flags: <defaults>
</compile_context>

<pallas_src>
import functools

import jax
import jax.numpy as jnp
from jax.experimental import pallas as pl
from jax.experimental.pallas import tpu as pltpu

_EPS = 1e-7
_LANES = 128                        # vreg lane width
_MAX_TILE = 4096                    # hard cap on batch-tile rows

# Conservative (v7x-safe, 64 MiB physical VMEM) defaults; raised at call time
# on 128-MiB-VMEM parts (v5e / v6e).
_DEFAULT_VMEM_BUDGET = 28 * 1024 * 1024
_DEFAULT_VMEM_LIMIT = 48 * 1024 * 1024


def _round_up(x, m):
    return -(-x // m) * m


def _vmem_budget_and_limit():
    """Generation-aware VMEM sizing: (tile budget bytes, scoped limit bytes)."""
    try:
        cap = getattr(pltpu.get_tpu_info(), "vmem_capacity_bytes", None)
    except Exception:                       # not a TPU / interpret mode / old runtime
        cap = None
    if cap is not None and cap >= 100 * 1024 * 1024:     # v5e / v6e: 128 MiB physical
        return 56 * 1024 * 1024, 96 * 1024 * 1024
    return _DEFAULT_VMEM_BUDGET, _DEFAULT_VMEM_LIMIT      # v7x (64 MiB) or unknown


def _pick_block_rows(batch, time_step, itemsize, vmem_budget, granule=8):
    """Largest multiple of `granule` rows whose double-buffered in+out tiles plus
    f32 in-kernel temporaries fit the VMEM budget, capped so the 'parallel' grid
    axis has >= 2 steps whenever the batch is splittable (v7x has 2 TensorCores)."""
    if batch <= granule:
        return batch                        # block == full array dim is always legal
    io_bytes = 2 * 2 * time_step * itemsize          # (in + out) x double buffer
    tmp_bytes = 8 * time_step * 4                    # f32 compute temporaries
    per_row = io_bytes + tmp_bytes
    tile = max(granule, (vmem_budget // per_row) // granule * granule)
    tile = min(tile, _MAX_TILE)
    # Keep at least 2 grid steps so both v7x TensorCores are busy.
    tile = min(tile, _round_up(pl.cdiv(batch, 2), granule))
    return tile


def _kth_largest_knockout(x, k, axis=1):
    """k-th largest value along `axis`, counting duplicates (torch.topk semantics).

    Each round removes exactly one occurrence (the first) of the current max."""
    n = x.shape[axis]
    idx = jax.lax.broadcasted_iota(jnp.int32, x.shape, dimension=axis)

    def knock(work):
        cur_max = jnp.max(work, axis=axis, keepdims=True)
        first = jnp.min(jnp.where(work == cur_max, idx, n), axis=axis, keepdims=True)
        return jnp.where(idx == first, -jnp.inf, work)

    if k - 1 <= 8:                          # small static k: unroll in Python
        work = x
        for _ in range(k - 1):
            work = knock(work)
    else:                                   # large k: bound live ranges
        work = jax.lax.fori_loop(0, k - 1, lambda _, w: knock(w), x)
    return jnp.max(work, axis=axis, keepdims=True)


def _kth_largest_streaming(x_ref, k):
    """k-th largest per row for wide rows.

    Streams 128-lane chunks keeping k running per-lane maxima via a
    compare-exchange chain, then knocks out on the small
    (rows, 128*k [+ ragged tail]) candidate slab.  Every row element occupies
    at most one slab slot, so torch.topk duplicate counting is preserved."""
    rows, time_step = x_ref.shape
    nchunks = time_step // _LANES
    rem = time_step - nchunks * _LANES

    def insert(maxima, v):
        out = []
        for m in maxima:                    # keeps maxima sorted descending
            hi = jnp.maximum(m, v)
            v = jnp.minimum(m, v)
            out.append(hi)
        return tuple(out)

    def body(c, maxima):
        start = pl.multiple_of(c * _LANES, _LANES)
        v = x_ref[:, pl.ds(start, _LANES)].astype(jnp.float32)
        return insert(maxima, v)

    init = tuple(jnp.full((rows, _LANES), -jnp.inf, jnp.float32) for _ in range(k))
    maxima = jax.lax.fori_loop(0, nchunks, body, init)

    pieces = list(maxima)
    if rem:                                 # ragged tail goes straight into the slab
        pieces.append(x_ref[:, pl.ds(nchunks * _LANES, rem)].astype(jnp.float32))
    slab = jnp.concatenate(pieces, axis=1)
    return _kth_largest_knockout(slab, k, axis=1)


def _sparse_attention_kernel(x_ref, o_ref, *, k, streaming):
    """Threshold at the k-th largest value per row and renormalize."""
    x = x_ref[...].astype(jnp.float32)
    if streaming:
        delta = _kth_largest_streaming(x_ref, k)
    else:
        delta = _kth_largest_knockout(x, k, axis=1)
    delta = delta + _EPS
    attn_w = jnp.maximum(x - delta, 0.0)                     # clamp(min=0)
    attn_w_sum = jnp.sum(attn_w, axis=1, keepdims=True) + _EPS
    inv = pl.reciprocal(attn_w_sum, approx=False)            # exact; rides EUP slot
    o_ref[...] = (attn_w * inv).astype(o_ref.dtype)


def sparse_attention(attn_s, top_k=3):
    """JAX/Pallas equivalent of SparseAttention(top_k).forward(attn_s).

    attn_s: (batch, time_step) array of attention scores.
    """
    k = top_k + 1
    batch, time_step = attn_s.shape

    # Same static early-exit as the PyTorch module.
    if time_step <= k:
        return attn_s

    vmem_budget, vmem_limit = _vmem_budget_and_limit()
    itemsize = jnp.dtype(attn_s.dtype).itemsize
    block_rows = _pick_block_rows(batch, time_step, itemsize, vmem_budget)

    # Streaming selection pays off once the candidate slab (128*k wide) is much
    # narrower than the row itself.
    streaming = (time_step // _LANES) >= 2 * k

    kernel = functools.partial(_sparse_attention_kernel, k=k, streaming=streaming)
    # TODO(synk): for time_step so long that even an 8-row tile blows the VMEM
    # budget, split the time axis with an "arbitrary" grid dim and a carried
    # two-pass (find-delta, then threshold+renormalize) reduction.
    return pl.pallas_call(
        kernel,
        out_shape=jax.ShapeDtypeStruct((batch, time_step), attn_s.dtype),
        grid=(pl.cdiv(batch, block_rows),),
        in_specs=[pl.BlockSpec((block_rows, time_step), lambda i: (i, 0))],
        out_specs=pl.BlockSpec((block_rows, time_step), lambda i: (i, 0)),
        compiler_params=pltpu.CompilerParams(
            dimension_semantics=("parallel",),
            vmem_limit_bytes=vmem_limit,
        ),
    )(attn_s)


def _reference_sparse_attention(attn_s, top_k=3):
    """Pure-JAX reference mirroring the PyTorch code, for a correctness check."""
    k = top_k + 1
    time_step = attn_s.shape[1]
    if time_step <= k:
        return attn_s
    delta = jax.lax.top_k(attn_s, k)[0][:, -1:] + _EPS
    attn_w = jnp.maximum(attn_s - delta, 0.0)
    attn_w_sum = jnp.sum(attn_w, axis=1, keepdims=True) + _EPS
    return attn_w / attn_w_sum


if __name__ == "__main__":
    key = jax.random.PRNGKey(0)
    k1, k2, k3, k4 = jax.random.split(key, 4)

    def _check(name, a, top_k=3, tol=1e-5):
        out = jax.block_until_ready(sparse_attention(a, top_k=top_k))
        ref = _reference_sparse_attention(a, top_k=top_k)
        assert out.shape == a.shape and out.dtype == a.dtype, name
        assert jnp.allclose(out, ref, atol=tol, rtol=tol), name

    # Small shape, single block (knockout selection).
    a1 = jax.nn.softmax(jax.random.normal(k1, (8, 16), jnp.float32), axis=-1)
    _check("small", a1)

    # Wider batch: multi-step "parallel" grid (2 blocks of 128 rows).
    a2 = jax.nn.softmax(jax.random.normal(k2, (256, 16), jnp.float32), axis=-1)
    _check("wide batch", a2)

    # Batch not a multiple of the block: exercises the partial trailing block.
    a3 = jax.nn.softmax(jax.random.normal(k3, (20, 16), jnp.float32), axis=-1)
    _check("partial block", a3)

    # Long rows with a ragged tail: streaming per-lane top-k path.
    a4 = jax.nn.softmax(jax.random.normal(k4, (16, 1200), jnp.float32), axis=-1)
    _check("streaming", a4)

    # Early-exit branch (time_step <= top_k + 1) returns the input unchanged.
    small = a1[:, :4]
    out_small = jax.block_until_ready(sparse_attention(small, top_k=3))
    assert jnp.array_equal(out_small, small)

    print("KERNEL_OK")
</pallas_src>

<mosaic_0001>
module attributes {stable_mosaic.version = 11 : i64} {
  func.func @_sparse_attention_kernel(%arg0: i32, %arg1: memref<8x16xf32, #tpu.memory_space<vmem>>, %arg2: memref<8x16xf32, #tpu.memory_space<vmem>>) attributes {dimension_semantics = [#tpu.dimension_semantics<parallel>], iteration_bounds = array<i64: 1>, scalar_prefetch = 0 : i64, scratch_operands = 0 : i64, tpu.core_type = #tpu.core_type<tc>, window_params = [{transform_indices = @transform_0, window_bounds = array<i64: 8, 16>}, {transform_indices = @transform_1, window_bounds = array<i64: 8, 16>}]} {
    %c0 = arith.constant 0 : index
    %c0_0 = arith.constant 0 : index
    %0 = vector.load %arg1[%c0, %c0_0] : memref<8x16xf32, #tpu.memory_space<vmem>>, vector<8x16xf32>
    %1 = tpu.iota {dimensions = array<i32: 1>} : vector<8x16xi32>
    %cst = arith.constant dense<0xFF800000> : vector<8xf32>
    %2 = vector.multi_reduction <maximumf>, %0, %cst [1] : vector<8x16xf32> to vector<8xf32>
    %3 = vector.shape_cast %2 : vector<8xf32> to vector<8x1xf32>
    %4 = vector.broadcast %3 : vector<8x1xf32> to vector<8x16xf32>
    %5 = arith.cmpf oeq, %0, %4 : vector<8x16xf32>
    %c16_i32 = arith.constant 16 : i32
    %6 = vector.broadcast %c16_i32 : i32 to vector<8x16xi32>
    %7 = arith.select %5, %1, %6 : vector<8x16xi1>, vector<8x16xi32>
    %cst_1 = arith.constant dense<2147483647> : vector<8xi32>
    %8 = vector.multi_reduction <minsi>, %7, %cst_1 [1] : vector<8x16xi32> to vector<8xi32>
    %9 = vector.shape_cast %8 : vector<8xi32> to vector<8x1xi32>
    %10 = vector.broadcast %9 : vector<8x1xi32> to vector<8x16xi32>
    %11 = arith.cmpi eq, %1, %10 : vector<8x16xi32>
    %cst_2 = arith.constant 0xFF800000 : f32
    %12 = vector.broadcast %cst_2 : f32 to vector<8x16xf32>
    %13 = arith.select %11, %12, %0 : vector<8x16xi1>, vector<8x16xf32>
    %cst_3 = arith.constant dense<0xFF800000> : vector<8xf32>
    %14 = vector.multi_reduction <maximumf>, %13, %cst_3 [1] : vector<8x16xf32> to vector<8xf32>
    %15 = vector.shape_cast %14 : vector<8xf32> to vector<8x1xf32>
    %16 = vector.broadcast %15 : vector<8x1xf32> to vector<8x16xf32>
    %17 = arith.cmpf oeq, %13, %16 : vector<8x16xf32>
    %c16_i32_4 = arith.constant 16 : i32
    %18 = vector.broadcast %c16_i32_4 : i32 to vector<8x16xi32>
    %19 = arith.select %17, %1, %18 : vector<8x16xi1>, vector<8x16xi32>
    %cst_5 = arith.constant dense<2147483647> : vector<8xi32>
    %20 = vector.multi_reduction <minsi>, %19, %cst_5 [1] : vector<8x16xi32> to vector<8xi32>
    %21 = vector.shape_cast %20 : vector<8xi32> to vector<8x1xi32>
    %22 = vector.broadcast %21 : vector<8x1xi32> to vector<8x16xi32>
    %23 = arith.cmpi eq, %1, %22 : vector<8x16xi32>
    %cst_6 = arith.constant 0xFF800000 : f32
    %24 = vector.broadcast %cst_6 : f32 to vector<8x16xf32>
    %25 = arith.select %23, %24, %13 : vector<8x16xi1>, vector<8x16xf32>
    %cst_7 = arith.constant dense<0xFF800000> : vector<8xf32>
    %26 = vector.multi_reduction <maximumf>, %25, %cst_7 [1] : vector<8x16xf32> to vector<8xf32>
    %27 = vector.shape_cast %26 : vector<8xf32> to vector<8x1xf32>
    %28 = vector.broadcast %27 : vector<8x1xf32> to vector<8x16xf32>
    %29 = arith.cmpf oeq, %25, %28 : vector<8x16xf32>
    %c16_i32_8 = arith.constant 16 : i32
    %30 = vector.broadcast %c16_i32_8 : i32 to vector<8x16xi32>
    %31 = arith.select %29, %1, %30 : vector<8x16xi1>, vector<8x16xi32>
    %cst_9 = arith.constant dense<2147483647> : vector<8xi32>
    %32 = vector.multi_reduction <minsi>, %31, %cst_9 [1] : vector<8x16xi32> to vector<8xi32>
    %33 = vector.shape_cast %32 : vector<8xi32> to vector<8x1xi32>
    %34 = vector.broadcast %33 : vector<8x1xi32> to vector<8x16xi32>
    %35 = arith.cmpi eq, %1, %34 : vector<8x16xi32>
    %cst_10 = arith.constant 0xFF800000 : f32
    %36 = vector.broadcast %cst_10 : f32 to vector<8x16xf32>
    %37 = arith.select %35, %36, %25 : vector<8x16xi1>, vector<8x16xf32>
    %cst_11 = arith.constant dense<0xFF800000> : vector<8xf32>
    %38 = vector.multi_reduction <maximumf>, %37, %cst_11 [1] : vector<8x16xf32> to vector<8xf32>
    %39 = vector.shape_cast %38 : vector<8xf32> to vector<8x1xf32>
    %cst_12 = arith.constant 1.000000e-07 : f32
    %40 = vector.broadcast %cst_12 : f32 to vector<8x1xf32>
    %41 = arith.addf %39, %40 : vector<8x1xf32>
    %42 = vector.broadcast %41 : vector<8x1xf32> to vector<8x16xf32>
    %43 = arith.subf %0, %42 : vector<8x16xf32>
    %cst_13 = arith.constant 0.000000e+00 : f32
    %44 = vector.broadcast %cst_13 : f32 to vector<8x16xf32>
    %45 = arith.maximumf %43, %44 : vector<8x16xf32>
    %cst_14 = arith.constant dense<0.000000e+00> : vector<8xf32>
    %46 = vector.multi_reduction <add>, %45, %cst_14 [1] : vector<8x16xf32> to vector<8xf32>
    %47 = vector.shape_cast %46 : vector<8xf32> to vector<8x1xf32>
    %cst_15 = arith.constant 1.000000e-07 : f32
    %48 = vector.broadcast %cst_15 : f32 to vector<8x1xf32>
    %49 = arith.addf %47, %48 : vector<8x1xf32>
    %50 = tpu.reciprocal %49 : vector<8x1xf32> -> vector<8x1xf32>
    %51 = vector.broadcast %50 : vector<8x1xf32> to vector<8x16xf32>
    %52 = arith.mulf %45, %51 : vector<8x16xf32>
    %c0_16 = arith.constant 0 : index
    %c0_17 = arith.constant 0 : index
    %53 = vector.load %arg2[%c0_16, %c0_17] : memref<8x16xf32, #tpu.memory_space<vmem>>, vector<8x16xf32>
    tpu.vector_store %arg2[%c0_16, %c0_17], %52 {strides = array<i32>} : memref<8x16xf32, #tpu.memory_space<vmem>>, vector<8x16xf32>,
    return
  }
  func.func @transform_0(%arg0: i32) -> (i32, i32) {
    %c0_i32 = arith.constant 0 : i32
    %c0_i32_0 = arith.constant 0 : i32
    return %arg0, %c0_i32 : i32, i32
  }
  func.func @transform_1(%arg0: i32) -> (i32, i32) {
    %c0_i32 = arith.constant 0 : i32
    %c0_i32_0 = arith.constant 0 : i32
    return %arg0, %c0_i32 : i32, i32
  }
}

</mosaic_0001>

<bundles_post_ra>
// kernel: tpu_custom_call.1
= control target key start
LH: loop header
LB: loop body
LE: loop exit
PB: predicated region body
PF: predicated region fallthrough
CT: control target
= control target key end

     0   :  { %6 = vsyncpa [#allocation3], 0  ;;  %s233_s0 = inlined_call_operand.hbm [shape: f32[8,16], index: 0, kind: input, shape index: {}]   ;;  %s234_s1 = inlined_call_operand.hbm [shape: f32[8,16], index: 1, kind: output, shape index: {}]  }
   0x1   :  { %7 = vsyncpa [#allocation4], 0  ;;  %s13_s8 = sshll.u32 %s233_s0, 4  ;;  %s192_s9 = smov [#allocation2]   ;;  %s14_s8 = int_to_ptr.hbm [resolvable:$true] %s13_s8 }
   0x2   :  { %s15_s10 = sshll.u32 %s192_s9, 4  ;;  %s16_s10 = int_to_ptr.vmem [resolvable:$true] %s15_s10 }
   0x3   :  { %18 = dma.hbm_to_vmem [thread:$0]  %s14_s8, 128, %s16_s10, [#allocation3]  }
   0x4   :  { %188 = dma.done.wait [#allocation3], 128  }
   0x5   :  { %189 = vsyncadd [#allocation3], 4294967168  ;;  %vm26_vm0 = vcmask 130048   ;;  %v207_v0 = vld [vmem:[#allocation2] sm:$0xff]  ;;  %v24_v2 = vlaneseq  ;;  %s193_s0 = smov [#allocation5]   ;;  %s126_s14 = sshll.u32 %s234_s1, 4  ;;  %s127_s14 = int_to_ptr.hbm [resolvable:$true] %s126_s14 }
   0x6   :  { %v27_v1 = vsel %vm26_vm0, %v207_v0, -inf  ;;  %s124_s11 = sshll.u32 %s193_s0, 4  ;;  %s125_s11 = int_to_ptr.vmem [resolvable:$true] %s124_s11 }
   0x7   :  { %28 = vmax.xlane.f32.xlu0 %v27_v1  ;;  %v211_v3 = vand.u32 127, %v24_v2 }
  0x7a   :  { %v29_v4 = vpop.xlane.xlu0 %28 }
  0x7b   :  { %vm30_vm1 = vcmp.eq.f32.partialorder %v207_v0, %v29_v4 }
  0x7c   :  { %v31_v5 = vsel %vm30_vm1, %v211_v3, 16 }
  0x7d   :  { %v32_v6 = vsel %vm26_vm0, %v31_v5, 2147483647 }
  0x7e   :  { %v34_v7 = vshra.s32 %v32_v6, 16  ;;  %v33_v9 = vand.u32 65535, %v32_v6 }
  0x80   :  { %v36_v8 = vcvt.s32.f32 %v34_v7  ;;  %v35_v11 = vcvt.s32.f32 %v33_v9 }
  0x82   :  { %37 = vmin.xlane.f32.xlu0 %v36_v8 }
  0xf5   :  { %v38_v10 = vpop.xlane.xlu0 %37 }
  0xf6   :  { %vm39_vm2 = vcmp.eq.f32.partialorder %v36_v8, %v38_v10  ;;  %v44_v13 = vcvt.f32.s32 %v38_v10 }
  0xf7   :  { %v40_v12 = vsel %vm39_vm2, %v35_v11, inf }
  0xf8   :  { %41 = vmin.xlane.f32.xlu1 %v40_v12  ;;  %v45_v15 = vshll.u32 %v44_v13, 16 }
 0x16b   :  { %v42_v14 = vpop.xlane.xlu1 %41 }
 0x16c   :  { %v43_v16 = vcvt.f32.s32 %v42_v14 }
 0x16e   :  { %v46_v17 = vadd.s32 %v45_v15, %v43_v16 }
 0x170   :  { %vm47_vm3 = vcmp.eq.s32.totalorder %v211_v3, %v46_v17 }
 0x171   :  { %v48_v18 = vsel %vm47_vm3, -inf, %v207_v0 }
 0x172   :  { %v49_v19 = vsel %vm26_vm0, %v48_v18, -inf }
 0x173   :  { %50 = vmax.xlane.f32.xlu1 %v49_v19 }
 0x1e6   :  { %v51_v20 = vpop.xlane.xlu1 %50 }
 0x1e7   :  { %vm52_vm4 = vcmp.eq.f32.partialorder %v48_v18, %v51_v20 }
 0x1e8   :  { %v53_v21 = vsel %vm52_vm4, %v211_v3, 16 }
 0x1e9   :  { %v54_v22 = vsel %vm26_vm0, %v53_v21, 2147483647 }
 0x1ea   :  { %v56_v23 = vshra.s32 %v54_v22, 16  ;;  %v55_v25 = vand.u32 65535, %v54_v22 }
 0x1ec   :  { %v58_v24 = vcvt.s32.f32 %v56_v23  ;;  %v57_v27 = vcvt.s32.f32 %v55_v25 }
 0x1ee   :  { %59 = vmin.xlane.f32.xlu2 %v58_v24 }
 0x261   :  { %v60_v26 = vpop.xlane.xlu2 %59 }
 0x262   :  { %vm61_vm5 = vcmp.eq.f32.partialorder %v58_v24, %v60_v26  ;;  %v66_v29 = vcvt.f32.s32 %v60_v26 }
 0x263   :  { %v62_v28 = vsel %vm61_vm5, %v57_v27, inf }
 0x264   :  { %63 = vmin.xlane.f32.xlu2 %v62_v28  ;;  %v67_v31 = vshll.u32 %v66_v29, 16 }
 0x2d7   :  { %v64_v30 = vpop.xlane.xlu2 %63 }
 0x2d8   :  { %v65_v32 = vcvt.f32.s32 %v64_v30 }
 0x2da   :  { %v68_v33 = vadd.s32 %v67_v31, %v65_v32 }
 0x2dc   :  { %vm69_vm6 = vcmp.eq.s32.totalorder %v211_v3, %v68_v33 }
 0x2dd   :  { %v70_v34 = vsel %vm69_vm6, -inf, %v48_v18 }
 0x2de   :  { %v71_v35 = vsel %vm26_vm0, %v70_v34, -inf }
 0x2df   :  { %72 = vmax.xlane.f32.xlu0 %v71_v35 }
 0x352   :  { %v73_v36 = vpop.xlane.xlu0 %72 }
 0x353   :  { %vm74_vm7 = vcmp.eq.f32.partialorder %v70_v34, %v73_v36 }
 0x354   :  { %v75_v37 = vsel %vm74_vm7, %v211_v3, 16 }
 0x355   :  { %v76_v38 = vsel %vm26_vm0, %v75_v37, 2147483647 }
 0x356   :  { %v78_v39 = vshra.s32 %v76_v38, 16  ;;  %v77_v41 = vand.u32 65535, %v76_v38 }
 0x358   :  { %v80_v40 = vcvt.s32.f32 %v78_v39  ;;  %v79_v43 = vcvt.s32.f32 %v77_v41 }
 0x35a   :  { %81 = vmin.xlane.f32.xlu1 %v80_v40 }
 0x3cd   :  { %v82_v42 = vpop.xlane.xlu1 %81 }
 0x3ce   :  { %vm83_vm8 = vcmp.eq.f32.partialorder %v80_v40, %v82_v42  ;;  %v88_v45 = vcvt.f32.s32 %v82_v42 }
 0x3cf   :  { %v84_v44 = vsel %vm83_vm8, %v79_v43, inf }
 0x3d0   :  { %85 = vmin.xlane.f32.xlu2 %v84_v44  ;;  %v89_v47 = vshll.u32 %v88_v45, 16 }
 0x443   :  { %v86_v46 = vpop.xlane.xlu2 %85 }
 0x444   :  { %v87_v48 = vcvt.f32.s32 %v86_v46 }
 0x446   :  { %v90_v49 = vadd.s32 %v89_v47, %v87_v48 }
 0x448   :  { %vm91_vm9 = vcmp.eq.s32.totalorder %v211_v3, %v90_v49 }
 0x449   :  { %v92_v50 = vsel %vm91_vm9, -inf, %v70_v34 }
 0x44a   :  { %v93_v51 = vsel %vm26_vm0, %v92_v50, -inf }
 0x44b   :  { %94 = vmax.xlane.f32.xlu0 %v93_v51 }
 0x4be   :  { %v95_v52 = vpop.xlane.xlu0 %94 }
 0x4bf   :  { %v96_v53 = vadd.f32 1e-07, %v95_v52 }
 0x4c1   :  { %v97_v54 = vsub.f32 %v207_v0, %v96_v53 }
 0x4c3   :  { %v98_v55 = vmax.f32 %v97_v54, 0.0 }
 0x4c5   :  { %v99_v56 = vsel %vm26_vm0, %v98_v55, 0.0 }
 0x4c6   :  { %100 = vadd.xlane.f32.xlu1 %v99_v56 }
 0x539   :  { %v101_v57 = vpop.xlane.xlu1 %100 }
 0x53a   :  { %v102_v58 = vadd.f32 1e-07, %v101_v57 }
 0x53c   :  { %138 = vrcp.f32 %v102_v58  ;;  %v114_v62 = vand.u32 2147483648, %v102_v58  ;;  %v112_v1 = vand.u32 2147483647, %v102_v58  ;;  %vm108_vm11 = vweird.f32 %v102_v58 }
 0x53e   :  { %v115_v3 = vor.u32 1.1754944e-38, %v114_v62  ;;  %vm113_vm13 = vcmp.eq.f32.partialorder %v112_v1, 8.507059e+37 }
 0x542   :  { %v139_v59 = vpop.eup %138 }
 0x543   :  { %v104_v60 = vmul.f32 %v139_v59, %v102_v58  ;;  %vm109_vm10 = vweird.f32 %v139_v59 }
 0x544   :  { %vm110_vm12 = vmor %vm108_vm11, %vm109_vm10 }
 0x545   :  { %v105_v61 = vsub.f32 1.0, %v104_v60 }
 0x547   :  { %v106_v63 = vmul.f32 %v139_v59, %v105_v61 }
 0x549   :  { %v107_v2 = vadd.f32 %v139_v59, %v106_v63 }
 0x54b   :  { %v111_v0 = vsel %vm110_vm12, %v139_v59, %v107_v2 }
 0x54c   :  { %v116_v4 = vsel %vm113_vm13, %v115_v3, %v111_v0 }
 0x54d   :  { %v117_v5 = vmul.f32 %v116_v4, %v98_v55 }
 0x54f   :  { %118 = vst.msk [vmem:[#allocation5] sm:$0xff] %vm26_vm0, %v117_v5 }
 0x550   :  { %129 = dma.vmem_to_hbm [thread:$0]  %s125_s11, 128, %s127_s14, [#allocation4]  }
 0x551   :  { %190 = dma.done.wait [#allocation4], 128  }
 0x552   :  { %191 = vsyncadd [#allocation4], 4294967168 }
 0x553   :  { %134 = vsyncpa [#allocation3], 1 }
 0x554   :  { %135 = vsyncpa [#allocation4], 1 }

</bundles_post_ra>
